<compile_context>
chip_gen: v7x
topology: tpu7x:2x2x1
jax: 0.10.0
libtpu: 0.0.40
codegen_flags: <defaults>
</compile_context>

<pallas_src>
import functools

import jax
import jax.numpy as jnp
from jax.experimental import pallas as pl
from jax.experimental.pallas import tpu as pltpu

EPS = 1e-5


# ------------------------------ Pallas kernels ------------------------------ #
def _conv1_bn_relu_kernel(x_ref, w_ref, b_ref, o_ref, *, stride, Ho):
    """3x3 conv (stride via H-phase rows) + folded-BN1 bias + ReLU.

    x_ref : (1, s, Hph, Wp*Cin)   bf16  padded input rows, stride-phase split
    w_ref : (3*Wp*Cin, Wo*Cout)   bf16  block-Toeplitz conv1 weight (BN folded)
    b_ref : (1, Wo*Cout)          f32   BN1 bias tiled across output columns
    o_ref : (1, Ho, Wo*Cout)      bf16  lane-dense conv1 output (no border)
    """
    taps = [x_ref[0, di % stride, di // stride: di // stride + Ho, :]
            for di in range(3)]
    lhs = jnp.concatenate(taps, axis=-1)                  # (Ho, 3*Wp*Cin)
    acc = jnp.dot(lhs, w_ref[...], preferred_element_type=jnp.float32)
    o_ref[0] = jnp.maximum(acc + b_ref[...], 0.0).astype(o_ref.dtype)


def _conv2_bn_add_relu_kernel(h_ref, w_ref, add_ref, sc_ref, b_ref, o_ref, *,
                              Ho, Cout, identity):
    """3x3 conv + folded-BN2 + fused shortcut + residual add + ReLU.

    h_ref  : (1, Ho, Wo*Cout)           bf16  conv1 output (unpadded)
    w_ref  : (3*(Wo+2)*Cout, Wo*Cout)   bf16  block-Toeplitz conv2 weight
    add_ref: (1, Ho, Wo*Csc)   f32 (identity) | bf16 (projection shortcut)
    sc_ref : (1, Wo*Cout) f32 BN-scale row | (Wo*Cin, Wo*Cout) bf16 1x1 weight
    b_ref  : (1, Wo*Cout)               f32   c2 + csc (both shortcut paths)
    o_ref  : (1, Ho, Wo*Cout)           f32
    """
    h = h_ref[0]
    # Build the 1-pixel zero border in registers (single final store).
    zc = jnp.zeros((Ho, Cout), h.dtype)
    hp = jnp.concatenate([zc, h, zc], axis=1)             # (Ho, (Wo+2)*Cout)
    zr = jnp.zeros((1, hp.shape[1]), h.dtype)
    hp = jnp.concatenate([zr, hp, zr], axis=0)            # (Ho+2, (Wo+2)*Cout)
    lhs = jnp.concatenate([hp[di:di + Ho, :] for di in range(3)], axis=-1)
    acc = jnp.dot(lhs, w_ref[...], preferred_element_type=jnp.float32)
    add = add_ref[0]
    if identity:
        sc = add * sc_ref[...]                            # f32, element-wise BN
    else:
        sc = jnp.dot(add, sc_ref[...], preferred_element_type=jnp.float32)
    o_ref[0] = jnp.maximum(acc + b_ref[...] + sc, 0.0).astype(o_ref.dtype)


# ------------------------------ Pallas wrappers ------------------------------ #
def _row_phases(x_nhwc, stride):
    """Pad NHWC input and split rows by stride phase, flat (W+2)*C minor dim."""
    N, H, W, C = x_nhwc.shape
    Ho = (H - 1) // stride + 1
    Wo = (W - 1) // stride + 1
    Wp = W + 2
    Hph = Ho + (2 // stride)
    xp = jnp.pad(x_nhwc, ((0, 0), (1, 1), (1, 1), (0, 0)))
    xp = xp.reshape(N, H + 2, Wp * C)
    phases = []
    for a in range(stride):
        pa = xp[:, a::stride, :][:, :Hph, :]
        if pa.shape[1] < Hph:
            pa = jnp.pad(pa, ((0, 0), (0, Hph - pa.shape[1]), (0, 0)))
        phases.append(pa)
    return jnp.stack(phases, axis=1), Ho, Wo, Wp          # (N, s, Hph, Wp*C)


def _toeplitz_weight(w_hwio, wp, wo, stride, dtype=jnp.bfloat16):
    """(3,3,Cin,Cout) -> block-Toeplitz (3*Wp*Cin, Wo*Cout).

    Turns the whole 3x3 conv (column taps + column stride) into one row-wise
    matmul with K = 3*Wp*Cin, keeping the MXU contraction deep and the output
    layout lane-dense (minor dim = Wo*Cout).
    """
    _, _, cin, cout = w_hwio.shape
    dj = jnp.arange(wp)[:, None] - stride * jnp.arange(wo)[None, :]   # (Wp, Wo)
    valid = (dj >= 0) & (dj <= 2)
    big = w_hwio[:, jnp.clip(dj, 0, 2)]                   # (3, Wp, Wo, Cin, Cout)
    big = jnp.where(valid[None, :, :, None, None], big, 0.0)
    big = jnp.transpose(big, (0, 1, 3, 2, 4))             # (3, Wp, Cin, Wo, Cout)
    return big.reshape(3 * wp * cin, wo * cout).astype(dtype)


def conv1_bn_relu(xrows, w1t, b1row, Ho, Wo, Cout):
    N, s, Hph, WC = xrows.shape
    kernel = functools.partial(_conv1_bn_relu_kernel, stride=s, Ho=Ho)
    return pl.pallas_call(
        kernel,
        out_shape=jax.ShapeDtypeStruct((N, Ho, Wo * Cout), jnp.bfloat16),
        grid=(N,),
        in_specs=[
            pl.BlockSpec((1, s, Hph, WC), lambda n: (n, 0, 0, 0)),
            pl.BlockSpec(w1t.shape, lambda n: (0, 0)),
            pl.BlockSpec(b1row.shape, lambda n: (0, 0)),
        ],
        out_specs=pl.BlockSpec((1, Ho, Wo * Cout), lambda n: (n, 0, 0)),
        compiler_params=pltpu.CompilerParams(dimension_semantics=("parallel",)),
    )(xrows, w1t, b1row)


def conv2_bn_add_relu(hmid, w2t, add, scv, b2row, identity, Ho, Wo, Cout):
    N = hmid.shape[0]
    kernel = functools.partial(_conv2_bn_add_relu_kernel, Ho=Ho, Cout=Cout,
                               identity=identity)
    return pl.pallas_call(
        kernel,
        out_shape=jax.ShapeDtypeStruct((N, Ho, Wo * Cout), jnp.float32),
        grid=(N,),
        in_specs=[
            pl.BlockSpec((1, Ho, Wo * Cout), lambda n: (n, 0, 0)),
            pl.BlockSpec(w2t.shape, lambda n: (0, 0)),
            pl.BlockSpec((1,) + add.shape[1:], lambda n: (n, 0, 0)),
            pl.BlockSpec(scv.shape, lambda n: (0, 0)),
            pl.BlockSpec(b2row.shape, lambda n: (0, 0)),
        ],
        out_specs=pl.BlockSpec((1, Ho, Wo * Cout), lambda n: (n, 0, 0)),
        compiler_params=pltpu.CompilerParams(dimension_semantics=("parallel",)),
    )(hmid, w2t, add, scv, b2row)


# --------------------------------- JAX glue ---------------------------------- #
def _fold_bn(gamma, beta, mean, var):
    scale = gamma / jnp.sqrt(var + EPS)
    return scale, beta - mean * scale


def init_basic_block(key, in_channels, out_channels, stride):
    """Deterministic synthetic params (BN folded to scale/bias, eval mode)."""
    ks = jax.random.split(key, 16)
    p = {}
    p["w1"] = 0.1 * jax.random.normal(ks[0], (3, 3, in_channels, out_channels), jnp.float32)
    p["s1"], p["c1"] = _fold_bn(
        1.0 + 0.1 * jax.random.normal(ks[1], (out_channels,), jnp.float32),
        0.1 * jax.random.normal(ks[2], (out_channels,), jnp.float32),
        0.1 * jax.random.normal(ks[3], (out_channels,), jnp.float32),
        0.5 + jnp.abs(jax.random.normal(ks[4], (out_channels,), jnp.float32)),
    )
    p["w2"] = 0.1 * jax.random.normal(ks[5], (3, 3, out_channels, out_channels), jnp.float32)
    p["s2"], p["c2"] = _fold_bn(
        1.0 + 0.1 * jax.random.normal(ks[6], (out_channels,), jnp.float32),
        0.1 * jax.random.normal(ks[7], (out_channels,), jnp.float32),
        0.1 * jax.random.normal(ks[8], (out_channels,), jnp.float32),
        0.5 + jnp.abs(jax.random.normal(ks[9], (out_channels,), jnp.float32)),
    )
    if in_channels != out_channels or stride != 1:
        p["wsc"] = 0.1 * jax.random.normal(ks[10], (1, 1, in_channels, out_channels), jnp.float32)
    p["ssc"], p["csc"] = _fold_bn(
        1.0 + 0.1 * jax.random.normal(ks[11], (out_channels,), jnp.float32),
        0.1 * jax.random.normal(ks[12], (out_channels,), jnp.float32),
        0.1 * jax.random.normal(ks[13], (out_channels,), jnp.float32),
        0.5 + jnp.abs(jax.random.normal(ks[14], (out_channels,), jnp.float32)),
    )
    return p


def basic_block_forward(x_nchw, params, stride):
    """Pallas implementation of BasicBlock.forward (inference-mode BN)."""
    x = jnp.transpose(x_nchw, (0, 2, 3, 1)).astype(jnp.float32)      # NCHW->NHWC
    N, H, W, Cin = x.shape
    Cout = params["w1"].shape[-1]

    # conv1 + BN1 + ReLU: block-Toeplitz weight, tiled bias row, bf16 operands.
    xrows, Ho, Wo, Wp = _row_phases(x.astype(jnp.bfloat16), stride)
    w1t = _toeplitz_weight(params["w1"] * params["s1"], Wp, Wo, stride)
    b1row = jnp.tile(params["c1"], Wo).reshape(1, Wo * Cout).astype(jnp.float32)
    hmid = conv1_bn_relu(xrows, w1t, b1row, Ho, Wo, Cout)

    # conv2 weight (stride 1 on the (Ho, Wo) grid) and combined bias (c2+csc).
    w2t = _toeplitz_weight(params["w2"] * params["s2"], Wo + 2, Wo, 1)
    b2row = jnp.tile(params["c2"] + params["csc"], Wo).reshape(1, Wo * Cout)
    b2row = b2row.astype(jnp.float32)

    # Shortcut operand (fused into kernel 2).
    if "wsc" in params:      # 1x1 strided conv + BN (projection shortcut)
        xs = x[:, ::stride, ::stride, :][:, :Ho, :Wo, :]
        add = xs.reshape(N, Ho, Wo * Cin).astype(jnp.bfloat16)
        wsc = params["wsc"].reshape(Cin, Cout) * params["ssc"]
        scv = jnp.kron(jnp.eye(Wo, dtype=wsc.dtype), wsc).astype(jnp.bfloat16)
        identity = False
    else:                    # BN-only shortcut: element-wise, stays f32
        add = x.reshape(N, H, W * Cin)                    # == (N, Ho, Wo*Cout)
        scv = jnp.tile(params["ssc"], Wo).reshape(1, Wo * Cout).astype(jnp.float32)
        identity = True

    # conv2 + BN2 + shortcut + add + ReLU (single fused kernel).
    out = conv2_bn_add_relu(hmid, w2t, add, scv, b2row, identity, Ho, Wo, Cout)
    out = out.reshape(N, Ho, Wo, Cout)
    return jnp.transpose(out, (0, 3, 1, 2))               # NHWC -> NCHW


def basic_block_reference(x_nchw, params, stride):
    """Pure-JAX reference (lax.conv, f32) for correctness checking."""
    dn = ("NHWC", "HWIO", "NHWC")
    x = jnp.transpose(x_nchw, (0, 2, 3, 1))
    h = jax.lax.conv_general_dilated(x, params["w1"], (stride, stride),
                                     ((1, 1), (1, 1)), dimension_numbers=dn)
    h = jnp.maximum(h * params["s1"] + params["c1"], 0.0)
    r = jax.lax.conv_general_dilated(h, params["w2"], (1, 1),
                                     ((1, 1), (1, 1)), dimension_numbers=dn)
    r = r * params["s2"] + params["c2"]
    if "wsc" in params:
        sc = jax.lax.conv_general_dilated(x, params["wsc"], (stride, stride),
                                          ((0, 0), (0, 0)), dimension_numbers=dn)
        sc = sc * params["ssc"] + params["csc"]
    else:
        sc = x * params["ssc"] + params["csc"]
    return jnp.transpose(jnp.maximum(r + sc, 0.0), (0, 3, 1, 2))


if __name__ == "__main__":
    key = jax.random.PRNGKey(0)
    fwd = jax.jit(basic_block_forward, static_argnames=("stride",))

    # case 1: downsampling block (1x1-conv + BN shortcut), x: NCHW [2, 4, 16, 16]
    k1, k2, k3, k4 = jax.random.split(key, 4)
    x1 = jax.random.normal(k1, (2, 4, 16, 16), jnp.float32)
    p1 = init_basic_block(k2, in_channels=4, out_channels=8, stride=2)
    out1 = jax.block_until_ready(fwd(x1, p1, stride=2))
    ref1 = basic_block_reference(x1, p1, stride=2)
    assert out1.shape == (2, 8, 8, 8)
    # bf16 MXU operands -> loosened tolerance vs the f32 reference
    assert jnp.allclose(out1, ref1, atol=5e-2, rtol=5e-2), \
        float(jnp.max(jnp.abs(out1 - ref1)))

    # case 2: identity-shaped block (BN-only shortcut), x: NCHW [2, 8, 16, 16]
    x2 = jax.random.normal(k3, (2, 8, 16, 16), jnp.float32)
    p2 = init_basic_block(k4, in_channels=8, out_channels=8, stride=1)
    out2 = jax.block_until_ready(fwd(x2, p2, stride=1))
    ref2 = basic_block_reference(x2, p2, stride=1)
    assert out2.shape == (2, 8, 16, 16)
    assert jnp.allclose(out2, ref2, atol=5e-2, rtol=5e-2), \
        float(jnp.max(jnp.abs(out2 - ref2)))

    print("KERNEL_OK")
</pallas_src>

<mosaic_0001>
module attributes {stable_mosaic.version = 11 : i64} {
  func.func @_conv1_bn_relu_kernel(%arg0: i32, %arg1: memref<1x2x9x72xbf16, #tpu.memory_space<vmem>>, %arg2: memref<216x64xbf16, #tpu.memory_space<vmem>>, %arg3: memref<1x64xf32, #tpu.memory_space<vmem>>, %arg4: memref<1x8x64xbf16, #tpu.memory_space<vmem>>) attributes {dimension_semantics = [#tpu.dimension_semantics<parallel>], iteration_bounds = array<i64: 2>, scalar_prefetch = 0 : i64, scratch_operands = 0 : i64, tpu.core_type = #tpu.core_type<tc>, window_params = [{transform_indices = @transform_0, window_bounds = array<i64: 1, 2, 9, 72>}, {pipeline_mode = #tpu.pipeline_mode<synchronous>, transform_indices = @transform_1, window_bounds = array<i64: 216, 64>}, {pipeline_mode = #tpu.pipeline_mode<synchronous>, transform_indices = @transform_2, window_bounds = array<i64: 1, 64>}, {transform_indices = @transform_3, window_bounds = array<i64: 1, 8, 64>}]} {
    %c0 = arith.constant 0 : index
    %c0_0 = arith.constant 0 : index
    %c0_1 = arith.constant 0 : index
    %c0_2 = arith.constant 0 : index
    %0 = vector.load %arg1[%c0, %c0_0, %c0_1, %c0_2] : memref<1x2x9x72xbf16, #tpu.memory_space<vmem>>, vector<1x1x8x72xbf16>
    %1 = vector.shape_cast %0 : vector<1x1x8x72xbf16> to vector<8x72xbf16>
    %c0_3 = arith.constant 0 : index
    %c1 = arith.constant 1 : index
    %c0_4 = arith.constant 0 : index
    %c0_5 = arith.constant 0 : index
    %2 = vector.load %arg1[%c0_3, %c1, %c0_4, %c0_5] : memref<1x2x9x72xbf16, #tpu.memory_space<vmem>>, vector<1x1x8x72xbf16>
    %3 = vector.shape_cast %2 : vector<1x1x8x72xbf16> to vector<8x72xbf16>
    %c0_6 = arith.constant 0 : index
    %c0_7 = arith.constant 0 : index
    %c1_8 = arith.constant 1 : index
    %c0_9 = arith.constant 0 : index
    %4 = vector.load %arg1[%c0_6, %c0_7, %c1_8, %c0_9] : memref<1x2x9x72xbf16, #tpu.memory_space<vmem>>, vector<1x1x8x72xbf16>
    %5 = vector.shape_cast %4 : vector<1x1x8x72xbf16> to vector<8x72xbf16>
    %6 = tpu.concatenate %1, %3, %5 in 1 : vector<8x72xbf16>, vector<8x72xbf16>, vector<8x72xbf16> -> vector<8x216xbf16>
    %c0_10 = arith.constant 0 : index
    %c0_11 = arith.constant 0 : index
    %7 = vector.load %arg2[%c0_10, %c0_11] : memref<216x64xbf16, #tpu.memory_space<vmem>>, vector<216x64xbf16>
    %cst = arith.constant dense<0.000000e+00> : vector<8x64xf32>
    %8 = tpu.matmul %6, %7, %cst {dimension_numbers = #tpu.dot_dimension_numbers<[1], [0], [0], [1], [0, 0, 1, 1], [], []>} : vector<8x216xbf16>, vector<216x64xbf16>, vector<8x64xf32> -> vector<8x64xf32>
    %c0_12 = arith.constant 0 : index
    %c0_13 = arith.constant 0 : index
    %9 = vector.load %arg3[%c0_12, %c0_13] : memref<1x64xf32, #tpu.memory_space<vmem>>, vector<1x64xf32>
    %10 = vector.broadcast %9 : vector<1x64xf32> to vector<8x64xf32>
    %11 = arith.addf %8, %10 : vector<8x64xf32>
    %cst_14 = arith.constant 0.000000e+00 : f32
    %12 = vector.broadcast %cst_14 : f32 to vector<8x64xf32>
    %13 = arith.maximumf %11, %12 : vector<8x64xf32>
    %14 = arith.truncf %13 : vector<8x64xf32> to vector<8x64xbf16>
    %c0_15 = arith.constant 0 : index
    %c0_16 = arith.constant 0 : index
    %c0_17 = arith.constant 0 : index
    %15 = vector.load %arg4[%c0_15, %c0_16, %c0_17] : memref<1x8x64xbf16, #tpu.memory_space<vmem>>, vector<1x8x64xbf16>
    %16 = vector.shape_cast %15 : vector<1x8x64xbf16> to vector<8x64xbf16>
    %17 = vector.shape_cast %14 : vector<8x64xbf16> to vector<1x8x64xbf16>
    tpu.vector_store %arg4[%c0_15, %c0_16, %c0_17], %17 {strides = array<i32>} : memref<1x8x64xbf16, #tpu.memory_space<vmem>>, vector<1x8x64xbf16>,
    return
  }
  func.func @transform_0(%arg0: i32) -> (i32, i32, i32, i32) {
    %c0_i32 = arith.constant 0 : i32
    %c0_i32_0 = arith.constant 0 : i32
    %c0_i32_1 = arith.constant 0 : i32
    %c0_i32_2 = arith.constant 0 : i32
    return %arg0, %c0_i32, %c0_i32_0, %c0_i32_1 : i32, i32, i32, i32
  }
  func.func @transform_1(%arg0: i32) -> (i32, i32) {
    %c0_i32 = arith.constant 0 : i32
    %c0_i32_0 = arith.constant 0 : i32
    %c0_i32_1 = arith.constant 0 : i32
    return %c0_i32, %c0_i32_0 : i32, i32
  }
  func.func @transform_2(%arg0: i32) -> (i32, i32) {
    %c0_i32 = arith.constant 0 : i32
    %c0_i32_0 = arith.constant 0 : i32
    %c0_i32_1 = arith.constant 0 : i32
    return %c0_i32, %c0_i32_0 : i32, i32
  }
  func.func @transform_3(%arg0: i32) -> (i32, i32, i32) {
    %c0_i32 = arith.constant 0 : i32
    %c0_i32_0 = arith.constant 0 : i32
    %c0_i32_1 = arith.constant 0 : i32
    return %arg0, %c0_i32, %c0_i32_0 : i32, i32, i32
  }
}

module attributes {stable_mosaic.version = 11 : i64} {
  func.func @_conv2_bn_add_relu_kernel(%arg0: i32, %arg1: memref<1x8x64xbf16, #tpu.memory_space<vmem>>, %arg2: memref<240x64xbf16, #tpu.memory_space<vmem>>, %arg3: memref<1x8x32xbf16, #tpu.memory_space<vmem>>, %arg4: memref<32x64xbf16, #tpu.memory_space<vmem>>, %arg5: memref<1x64xf32, #tpu.memory_space<vmem>>, %arg6: memref<1x8x64xf32, #tpu.memory_space<vmem>>) attributes {dimension_semantics = [#tpu.dimension_semantics<parallel>], iteration_bounds = array<i64: 2>, scalar_prefetch = 0 : i64, scratch_operands = 0 : i64, tpu.core_type = #tpu.core_type<tc>, window_params = [{transform_indices = @transform_0, window_bounds = array<i64: 1, 8, 64>}, {pipeline_mode = #tpu.pipeline_mode<synchronous>, transform_indices = @transform_1, window_bounds = array<i64: 240, 64>}, {transform_indices = @transform_2, window_bounds = array<i64: 1, 8, 32>}, {pipeline_mode = #tpu.pipeline_mode<synchronous>, transform_indices = @transform_3, window_bounds = array<i64: 32, 64>}, {pipeline_mode = #tpu.pipeline_mode<synchronous>, transform_indices = @transform_4, window_bounds = array<i64: 1, 64>}, {transform_indices = @transform_5, window_bounds = array<i64: 1, 8, 64>}]} {
    %c0 = arith.constant 0 : index
    %c0_0 = arith.constant 0 : index
    %c0_1 = arith.constant 0 : index
    %0 = vector.load %arg1[%c0, %c0_0, %c0_1] : memref<1x8x64xbf16, #tpu.memory_space<vmem>>, vector<1x8x64xbf16>
    %1 = vector.shape_cast %0 : vector<1x8x64xbf16> to vector<8x64xbf16>
    %cst = arith.constant 0.000000e+00 : bf16
    %2 = vector.broadcast %cst : bf16 to vector<8x8xbf16>
    %3 = tpu.concatenate %2, %1, %2 in 1 : vector<8x8xbf16>, vector<8x64xbf16>, vector<8x8xbf16> -> vector<8x80xbf16>
    %cst_2 = arith.constant 0.000000e+00 : bf16
    %4 = vector.broadcast %cst_2 : bf16 to vector<1x80xbf16>
    %5 = tpu.concatenate %4, %3, %4 in 0 : vector<1x80xbf16>, vector<8x80xbf16>, vector<1x80xbf16> -> vector<10x80xbf16>
    %6 = vector.extract_strided_slice %5 {offsets = [0, 0], sizes = [8, 80], strides = [1, 1]} : vector<10x80xbf16> to vector<8x80xbf16>
    %7 = vector.extract_strided_slice %5 {offsets = [1, 0], sizes = [8, 80], strides = [1, 1]} : vector<10x80xbf16> to vector<8x80xbf16>
    %8 = vector.extract_strided_slice %5 {offsets = [2, 0], sizes = [8, 80], strides = [1, 1]} : vector<10x80xbf16> to vector<8x80xbf16>
    %9 = tpu.concatenate %6, %7, %8 in 1 : vector<8x80xbf16>, vector<8x80xbf16>, vector<8x80xbf16> -> vector<8x240xbf16>
    %c0_3 = arith.constant 0 : index
    %c0_4 = arith.constant 0 : index
    %10 = vector.load %arg2[%c0_3, %c0_4] : memref<240x64xbf16, #tpu.memory_space<vmem>>, vector<240x64xbf16>
    %cst_5 = arith.constant dense<0.000000e+00> : vector<8x64xf32>
    %11 = tpu.matmul %9, %10, %cst_5 {dimension_numbers = #tpu.dot_dimension_numbers<[1], [0], [0], [1], [0, 0, 1, 1], [], []>} : vector<8x240xbf16>, vector<240x64xbf16>, vector<8x64xf32> -> vector<8x64xf32>
    %c0_6 = arith.constant 0 : index
    %c0_7 = arith.constant 0 : index
    %c0_8 = arith.constant 0 : index
    %12 = vector.load %arg3[%c0_6, %c0_7, %c0_8] : memref<1x8x32xbf16, #tpu.memory_space<vmem>>, vector<1x8x32xbf16>
    %13 = vector.shape_cast %12 : vector<1x8x32xbf16> to vector<8x32xbf16>
    %c0_9 = arith.constant 0 : index
    %c0_10 = arith.constant 0 : index
    %14 = vector.load %arg4[%c0_9, %c0_10] : memref<32x64xbf16, #tpu.memory_space<vmem>>, vector<32x64xbf16>
    %cst_11 = arith.constant dense<0.000000e+00> : vector<8x64xf32>
    %15 = tpu.matmul %13, %14, %cst_11 {dimension_numbers = #tpu.dot_dimension_numbers<[1], [0], [0], [1], [0, 0, 1, 1], [], []>} : vector<8x32xbf16>, vector<32x64xbf16>, vector<8x64xf32> -> vector<8x64xf32>
    %c0_12 = arith.constant 0 : index
    %c0_13 = arith.constant 0 : index
    %16 = vector.load %arg5[%c0_12, %c0_13] : memref<1x64xf32, #tpu.memory_space<vmem>>, vector<1x64xf32>
    %17 = vector.broadcast %16 : vector<1x64xf32> to vector<8x64xf32>
    %18 = arith.addf %11, %17 : vector<8x64xf32>
    %19 = arith.addf %18, %15 : vector<8x64xf32>
    %cst_14 = arith.constant 0.000000e+00 : f32
    %20 = vector.broadcast %cst_14 : f32 to vector<8x64xf32>
    %21 = arith.maximumf %19, %20 : vector<8x64xf32>
    %c0_15 = arith.constant 0 : index
    %c0_16 = arith.constant 0 : index
    %c0_17 = arith.constant 0 : index
    %22 = vector.load %arg6[%c0_15, %c0_16, %c0_17] : memref<1x8x64xf32, #tpu.memory_space<vmem>>, vector<1x8x64xf32>
    %23 = vector.shape_cast %22 : vector<1x8x64xf32> to vector<8x64xf32>
    %24 = vector.shape_cast %21 : vector<8x64xf32> to vector<1x8x64xf32>
    tpu.vector_store %arg6[%c0_15, %c0_16, %c0_17], %24 {strides = array<i32>} : memref<1x8x64xf32, #tpu.memory_space<vmem>>, vector<1x8x64xf32>,
    return
  }
  func.func @transform_0(%arg0: i32) -> (i32, i32, i32) {
    %c0_i32 = arith.constant 0 : i32
    %c0_i32_0 = arith.constant 0 : i32
    %c0_i32_1 = arith.constant 0 : i32
    return %arg0, %c0_i32, %c0_i32_0 : i32, i32, i32
  }
  func.func @transform_1(%arg0: i32) -> (i32, i32) {
    %c0_i32 = arith.constant 0 : i32
    %c0_i32_0 = arith.constant 0 : i32
    %c0_i32_1 = arith.constant 0 : i32
    return %c0_i32, %c0_i32_0 : i32, i32
  }
  func.func @transform_2(%arg0: i32) -> (i32, i32, i32) {
    %c0_i32 = arith.constant 0 : i32
    %c0_i32_0 = arith.constant 0 : i32
    %c0_i32_1 = arith.constant 0 : i32
    return %arg0, %c0_i32, %c0_i32_0 : i32, i32, i32
  }
  func.func @transform_3(%arg0: i32) -> (i32, i32) {
    %c0_i32 = arith.constant 0 : i32
    %c0_i32_0 = arith.constant 0 : i32
    %c0_i32_1 = arith.constant 0 : i32
    return %c0_i32, %c0_i32_0 : i32, i32
  }
  func.func @transform_4(%arg0: i32) -> (i32, i32) {
    %c0_i32 = arith.constant 0 : i32
    %c0_i32_0 = arith.constant 0 : i32
    %c0_i32_1 = arith.constant 0 : i32
    return %c0_i32, %c0_i32_0 : i32, i32
  }
  func.func @transform_5(%arg0: i32) -> (i32, i32, i32) {
    %c0_i32 = arith.constant 0 : i32
    %c0_i32_0 = arith.constant 0 : i32
    %c0_i32_1 = arith.constant 0 : i32
    return %arg0, %c0_i32, %c0_i32_0 : i32, i32, i32
  }
}

</mosaic_0001>

<bundles_post_ra>
// kernel: tile.13
= control target key start
LH: loop header
LB: loop body
LE: loop exit
PB: predicated region body
PF: predicated region fallthrough
CT: control target
= control target key end

     0   :  { %s22_s0 = inlined_call_operand.vmem [shape: f32[8], index: 0, kind: input, shape index: {}]   ;;  %s23_s1 = inlined_call_operand.vmem [shape: f32[8,8], index: 1, kind: output, shape index: {}]  }
   0x1   :  { %v4_v0 = vld [vmem:[%s22_s0] ss:$0 sm:$0xff] }
   0x2   :  { %5 = vst [vmem:[%s23_s1] sm:$0xff] %v4_v0 }

// kernel: tile.14
= control target key start
LH: loop header
LB: loop body
LE: loop exit
PB: predicated region body
PF: predicated region fallthrough
CT: control target
= control target key end

     0   :  { %s67_s10 = smov 56   ;;  %s68_s11 = smov 40   ;;  %vm3_vm0 = vcmask 64512   ;;  %vm9_vm1 = vcmask 523712   ;;  %vm15_vm2 = vcmask 458112   ;;  %vm21_vm3 = vcmask 392512   ;;  %s111_s0 = inlined_call_operand.vmem [shape: f32[8,8], index: 0, kind: input, shape index: {}]   ;;  %s112_s1 = inlined_call_operand.vmem [shape: f32[1,64], index: 1, kind: output, shape index: {}]  }
   0x1   :  { %v53_v0 = vld [vmem:[%s111_s0 + $0x7] sm:$0x1]   ;;  %v55_v1 = vld [vmem:[%s111_s0 + $0x5] sm:$0x1]   ;;  %v54_v2 = vld [vmem:[%s111_s0 + $0x6] sm:$0x1]  }
   0x2   :  { %7 = vrot.lane.b32.xlu0 %v53_v0, %s67_s10  ;;  %19 = vrot.lane.b32.xlu1 %v55_v1, %s68_s11  ;;  %v56_v3 = vld [vmem:[%s111_s0 + $0x4] sm:$0x1]   ;;  %v2_v4 = vld [vmem:[%s111_s0] sm:$0x1]   ;;  %s69_s18 = smov 48   ;;  %s70_s19 = smov 32  }
   0x3   :  { %4 = vst.msk [vmem:[#allocation0] sm:$0x1] %vm3_vm0, %v2_v4   ;;  %v57_v5 = vld [vmem:[%s111_s0 + $0x3] sm:$0x1]   ;;  %v58_v6 = vld [vmem:[%s111_s0 + $0x2] sm:$0x1]  }
   0x4   :  { %s71_s24 = smov 24   ;;  %s72_s25 = smov 16   ;;  %v59_v7 = vld [vmem:[%s111_s0 + $0x1] sm:$0x1]   ;;  %vm27_vm4 = vcmask 326912   ;;  %vm33_vm5 = vcmask 261312  }
   0x5   :  { %s73_s0 = smov 8   ;;  %vm39_vm6 = vcmask 195712   ;;  %vm45_vm7 = vcmask 130112  }
   0x6   :  { %13 = vrot.lane.b32.xlu0 %v54_v2, %s69_s18  ;;  %25 = vrot.lane.b32.xlu1 %v56_v3, %s70_s19 }
   0xa   :  { %31 = vrot.lane.b32.xlu0 %v57_v5, %s71_s24  ;;  %37 = vrot.lane.b32.xlu1 %v58_v6, %s72_s25 }
   0xe   :  { %43 = vrot.lane.b32.xlu0 %v59_v7, %s73_s0 }
  0x74   :  { %v8_v8 = vpop.permute.xlu0 %7   ;;  %v20_v9 = vpop.permute.xlu1 %19  }
  0x75   :  { %10 = vst.msk [vmem:[#allocation0] sm:$0x1] %vm9_vm1, %v8_v8  }
  0x78   :  { %v14_v10 = vpop.permute.xlu0 %13   ;;  %v26_v11 = vpop.permute.xlu1 %25  }
  0x79   :  { %16 = vst.msk [vmem:[#allocation0] sm:$0x1] %vm15_vm2, %v14_v10  }
  0x7a   :  { %22 = vst.msk [vmem:[#allocation0] sm:$0x1] %vm21_vm3, %v20_v9  }
  0x7b   :  { %28 = vst.msk [vmem:[#allocation0] sm:$0x1] %vm27_vm4, %v26_v11  }
  0x7c   :  { %v32_v12 = vpop.permute.xlu0 %31   ;;  %v38_v13 = vpop.permute.xlu1 %37  }
  0x7d   :  { %34 = vst.msk [vmem:[#allocation0] sm:$0x1] %vm33_vm5, %v32_v12  }
  0x7e   :  { %40 = vst.msk [vmem:[#allocation0] sm:$0x1] %vm39_vm6, %v38_v13  }
  0x80   :  { %v44_v14 = vpop.permute.xlu0 %43  }
  0x81   :  { %46 = vst.msk [vmem:[#allocation0] sm:$0x1] %vm45_vm7, %v44_v14  }
  0x88   :  { %v50_v15 = vld [vmem:[#allocation0] sm:$0x1] }
  0x89   :  { %52 = vst [vmem:[%s112_s1] sm:$0x1] %v50_v15 }

// kernel: basic_block_forward.2
= control target key start
LH: loop header
LB: loop body
LE: loop exit
PB: predicated region body
PF: predicated region fallthrough
CT: control target
= control target key end

     0   :  { %s508_s12 = smov 0   ;;  %s574_s0 = inlined_call_operand.vmem [shape: bf16[2,2,9,72], index: 0, kind: input, shape index: {}]   ;;  %s575_s1 = inlined_call_operand.vmem [shape: bf16[216,64], index: 1, kind: input, shape index: {}]   ;;  %s576_s2 = inlined_call_operand.vmem [shape: f32[1,64], index: 2, kind: input, shape index: {}]   ;;  %s577_s3 = inlined_call_operand.vmem [shape: bf16[2,8,64], index: 3, kind: output, shape index: {}]  }
   0x1 LB: > { %s420_s13 = sadd.s32 4294967295, %s483_s12   ;;  %p424_p0 = scmp.ge.s32.totalorder %s483_s12, 1  ;;  %s483_s12 = sphi %s508_s12, %s13_s12  }
   0x2   : > { %p137_p1 = scmp.lt.s32.totalorder %s483_s12, 3 }
   0x4   : > { %p138_p2 = pnand %p424_p0, %p137_p1 }
   0x5   : > { %p160_p3 = scmp.lt.s32.totalorder (!%p138_p2), %s420_s13, 1  ;;  %v463_v0 = vld [vmem:[%s575_s1] sm:$0xff] (!%p138_p2)   ;;  %v485_v1 = vmov (!%p138_p2), 0   ;;  %v464_v2 = vld [vmem:[%s575_s1 + $0x8] sm:$0xff] (!%p138_p2)   ;;  %v465_v3 = vld [vmem:[%s575_s1 + $0x10] sm:$0xff] (!%p138_p2)   ;;  %s486_s24 = smov (!%p138_p2), 72  }
   0x6   : > { %141 = sbr.rel (%p138_p2) target bundleno = 361 (0x169), region = 32  ;;  %323 = vmatprep.subr.bf16.mxu0 (!%p138_p2), %v485_v1  ;;  %v466_v10 = vld [vmem:[%s575_s1 + $0x18] sm:$0xff] (!%p138_p2)   ;;  %v467_v13 = vld [vmem:[%s575_s1 + $0x20] sm:$0xff] (!%p138_p2)   ;;  %s487_s29 = smov (!%p138_p2), 16   ;;  %v468_v14 = vld [vmem:[%s575_s1 + $0x28] sm:$0xff] (!%p138_p2)   ;;  %vm319_vm0 = vcmask (!%p138_p2), 1043456  }
   0x7   : > { %324 = vmatpush1.bf16.msra.mxu0 (!%p138_p2), %v463_v0  ;;  %v469_v15 = vld [vmem:[%s575_s1 + $0x30] sm:$0xff] (!%p138_p2)   ;;  %v470_v16 = vld [vmem:[%s575_s1 + $0x38] sm:$0xff] (!%p138_p2)   ;;  %v471_v17 = vld [vmem:[%s575_s1 + $0x40] sm:$0xff] (!%p138_p2)   ;;  %vm198_vm1 = vcmask (!%p138_p2), 130048   ;;  %vm316_vm2 = vcmask (!%p138_p2), 719872   ;;  %vm193_vm3 = vcmask (!%p138_p2), 588800  }
   0x8   : > { %325 = vmatprep.subr.bf16.mxu0 (!%p138_p2), %v485_v1  ;;  %v472_v18 = vld [vmem:[%s575_s1 + $0x48] sm:$0xff] (!%p138_p2)   ;;  %v473_v19 = vld [vmem:[%s575_s1 + $0x50] sm:$0xff] (!%p138_p2)   ;;  %v474_v20 = vld [vmem:[%s575_s1 + $0x58] sm:$0xff] (!%p138_p2)   ;;  %vm365_vm4 = vcmask (!%p138_p2), 519168  }
   0x9   : > { %v475_v21 = vld [vmem:[%s575_s1 + $0x60] sm:$0xff] (!%p138_p2)   ;;  %v476_v22 = vld [vmem:[%s575_s1 + $0x68] ss:$0 sps:$4 sm:$0xff] (!%p138_p2)  }
   0xa   : > { %v321_v23 = vsel (!%p138_p2), %vm319_vm0, %v476_v22, 0  ;;  %v431_v28 = vld [vmem:[%s576_s2] ss:$0 sm:$0xff] (!%p138_p2) }
   0xb   : > { %326 = vmatpush1.bf16.msra.mxu0 (!%p138_p2), %v464_v2 }
   0xc   : > { %327 = vmatprep.subr.bf16.mxu0 (!%p138_p2), %v485_v1 }
   0xd   : > { %s579_s13 = smov (!%p160_p3, %s420_s13), 1 }
   0xe   : > { %s449_s18 = sshll.u32 %s579_s13, 4  ;;  %s427_s25 = sshll.u32 %s579_s13, 2 }
   0xf   : > { %s164_s23 = scalar_lea.vmem %s574_s0, %s449_s18  ;;  %328 = vmatpush1.bf16.msra.mxu0 %v465_v3  ;;  %s168_s28 = scalar_lea.vmem %s577_s3, %s427_s25 }
  0x10   : > { %v173_v4 = vld [vmem:[%s164_s23 + $0x4] sm:$0x1]  ;;  %v461_v5 = vld [vmem:[%s164_s23 + $0x8] ss:$0 sps:$4 sm:$0xff]   ;;  %v170_v6 = vld [vmem:[%s164_s23] sm:$0xf]  ;;  %329 = vmatprep.subr.bf16.mxu0 %v485_v1 }
  0x11   : > { %177 = vrot.lane.b32.xlu0 %v461_v5, %s486_s24  ;;  %v430_v7 = vcombine.low %v170_v6, %v173_v4 }
  0x13   : > { %v185_v8 = vshrl.u32 %v430_v7, 16  ;;  %v187_v9 = vshll.u32 %v430_v7, 16  ;;  %330 = vmatpush1.bf16.msra.mxu0 %v466_v10 }
  0x14   : > { %331 = vmatprep.subr.bf16.mxu0 %v485_v1 }
  0x15   : > { %v189_v11 = vrot.slane %v187_v9, 1 }
  0x17   : > { %v190_v12 = vor.u32 %v189_v11, %v185_v8  ;;  %332 = vmatpush1.bf16.msra.mxu0 %v467_v13 }
  0x18   : > { %333 = vmatprep.subr.bf16.mxu0 %v485_v1 }
  0x19   : > { %191 = vrot.lane.b32.xlu0 %v190_v12, %s487_s29 }
  0x1b   : > { %334 = vmatpush1.bf16.msra.mxu0 %v468_v14 }
  0x1c   : > { %335 = vmatprep.subr.bf16.mxu0 %v485_v1 }
  0x1f   : > { %336 = vmatpush1.bf16.msra.mxu0 %v469_v15 }
  0x20   : > { %337 = vmatprep.subr.bf16.mxu0 %v485_v1 }
  0x23   : > { %338 = vmatpush1.bf16.msra.mxu0 %v470_v16 }
  0x24   : > { %339 = vmatprep.subr.bf16.mxu0 %v485_v1 }
  0x27   : > { %340 = vmatpush1.bf16.msra.mxu0 %v471_v17 }
  0x28   : > { %341 = vmatprep.subr.bf16.mxu0 %v485_v1 }
  0x2b   : > { %342 = vmatpush1.bf16.msra.mxu0 %v472_v18 }
  0x2c   : > { %343 = vmatprep.subr.bf16.mxu0 %v485_v1 }
  0x2f   : > { %344 = vmatpush1.bf16.msra.mxu0 %v473_v19 }
  0x30   : > { %345 = vmatprep.subr.bf16.mxu0 %v485_v1 }
  0x33   : > { %346 = vmatpush1.bf16.msra.mxu0 %v474_v20 }
  0x34   : > { %347 = vmatprep.subr.bf16.mxu0 %v485_v1 }
  0x37   : > { %348 = vmatpush1.bf16.msra.mxu0 %v475_v21 }
  0x38   : > { %349 = vmatprep.subr.bf16.mxu0 %v485_v1 }
  0x3b   : > { %350 = vmatpush1.bf16.msra.mxu0 %v321_v23 }
  0x83   : > { %v178_v24 = vpop.permute.xlu0 %177 }
  0x84   : > { %v196_v27 = vsel %vm193_vm3, %v170_v6, %v178_v24 }
  0x8b   : > { %v192_v25 = vpop.permute.xlu0 %191 }
  0x8c   : > { %v200_v26 = vsel %vm198_vm1, %v178_v24, %v192_v25 }
  0x8d   : > { %446 = vmatprep.mubr.msk.bf16.mxu0 %vm316_vm2, %v200_v26 }
  0x8e   : > { %356 = vmatmul.mubr.bf16.vlgmr.msra.gmra.mrb[0].mxu0 %v196_v27 }
 0x161   : > { %v357_v29 = vpop.f32.mrb[0].mxu0 }
 0x162   : > { %v358_v30 = vadd.f32 %v431_v28, %v357_v29  ;;  %v359_v31 = vpop.f32.mrb[1].mxu0 }
 0x163   : > { %v360_v32 = vpop.f32.mrb[2].mxu0 }
 0x164   : > { %v363_v33 = vmax.f32 %v358_v30, 0.0  ;;  %v361_v34 = vpop.f32.mrb[3].mxu0 }
 0x166   : > { %v364_v35 = vpack.c.bf16 %v363_v33, %v363_v33 }
 0x168   : > { %366 = vst.msk [vmem:[%s168_s28] sm:$0xf] %vm365_vm4, %v364_v35 }
 0x169 PF: > { %s13_s12 = sadd.s32 1, %s483_s12  }
 0x16a   : > { %p10_p4 = scmp.ge.s32.totalorder %s13_s12, 4  }
 0x16c   :  { %12 = sbr.rel (!%p10_p4) target bundleno = 1 (0x1), region = 63 }

// kernel: basic_block_forward.3
= control target key start
LH: loop header
LB: loop body
LE: loop exit
PB: predicated region body
PF: predicated region fallthrough
CT: control target
= control target key end

     0   :  { %s704_s18 = smov 0   ;;  %s788_s0 = inlined_call_operand.vmem [shape: bf16[2,8,64], index: 0, kind: input, shape index: {}]   ;;  %s789_s1 = inlined_call_operand.vmem [shape: bf16[240,64], index: 1, kind: input, shape index: {}]   ;;  %s790_s2 = inlined_call_operand.vmem [shape: bf16[2,8,32], index: 2, kind: input, shape index: {}]   ;;  %s791_s3 = inlined_call_operand.vmem [shape: bf16[32,64], index: 3, kind: input, shape index: {}]   ;;  %s792_s4 = inlined_call_operand.vmem [shape: f32[1,64], index: 4, kind: input, shape index: {}]   ;;  %s793_s5 = inlined_call_operand.vmem [shape: f32[2,8,64], index: 5, kind: output, shape index: {}]  }
   0x1 LB: > { %s584_s19 = sadd.s32 4294967295, %s666_s18   ;;  %p588_p0 = scmp.ge.s32.totalorder %s666_s18, 1  ;;  %s666_s18 = sphi %s704_s18, %s15_s18  }
   0x2   : > { %p195_p1 = scmp.lt.s32.totalorder %s666_s18, 3 }
   0x4   : > { %p196_p2 = pnand %p588_p0, %p195_p1 }
   0x5   : > { %p225_p3 = scmp.lt.s32.totalorder (!%p196_p2), %s584_s19, 1  ;;  %s668_s24 = smov (!%p196_p2), 8   ;;  %v643_v1 = vld [vmem:[%s789_s1] sm:$0xff] (!%p196_p2)   ;;  %v669_v2 = vmov (!%p196_p2), 0   ;;  %v670_v3 = vmov (!%p196_p2), 0.0   ;;  %v644_v4 = vld [vmem:[%s789_s1 + $0x8] sm:$0xff] (!%p196_p2)  }
   0x6   : > { %199 = sbr.rel (%p196_p2) target bundleno = 482 (0x1e2), region = 40  ;;  %475 = vmatprep.subr.bf16.mxu0 (!%p196_p2), %v669_v2  ;;  %618 = vmatprep.subr.bf16.mxu1 (!%p196_p2), %v670_v3  ;;  %v655_v5 = vld [vmem:[%s791_s3] sm:$0xff] (!%p196_p2)   ;;  %v645_v6 = vld [vmem:[%s789_s1 + $0x10] sm:$0xff] (!%p196_p2)   ;;  %v657_v7 = vld [vmem:[%s791_s3 + $0x8] sm:$0xff] (!%p196_p2)   ;;  %vm244_vm0 = vcmask (!%p196_p2), 64512   ;;  %vm248_vm1 = vcmask (!%p196_p2), 588800  }
   0x7   : > { %476 = vmatpush1.bf16.msra.mxu0 (!%p196_p2), %v643_v1  ;;  %619 = vmatpush3.bf16.msra.mxu1 (!%p196_p2), %v655_v5  ;;  %v646_v8 = vld [vmem:[%s789_s1 + $0x18] sm:$0xff] (!%p196_p2)   ;;  %v647_v9 = vld [vmem:[%s789_s1 + $0x20] sm:$0xff] (!%p196_p2)   ;;  %v648_v10 = vld [vmem:[%s789_s1 + $0x28] sm:$0xff] (!%p196_p2)   ;;  %vm282_vm2 = vcmask (!%p196_p2), 261120   ;;  %vm671_vm3 = vmmov (!%p196_p2), 0   ;;  %vm257_vm4 = vcmask (!%p196_p2), 1040384  }
   0x8   : > { %477 = vmatprep.subr.bf16.mxu0 (!%p196_p2), %v669_v2  ;;  %620 = vmatprep.subr.bf16.mxu1 (!%p196_p2), %v670_v3  ;;  %v649_v11 = vld [vmem:[%s789_s1 + $0x30] sm:$0xff] (!%p196_p2)   ;;  %v650_v12 = vld [vmem:[%s789_s1 + $0x38] sm:$0xff] (!%p196_p2)   ;;  %v651_v13 = vld [vmem:[%s789_s1 + $0x40] sm:$0xff] (!%p196_p2)   ;;  %vm258_vm5 = vsmask.f32 (!%p196_p2), 256  ;;  %vm261_vm6 = vcmask (!%p196_p2), 1044480  }
   0x9   : > { %v652_v14 = vld [vmem:[%s789_s1 + $0x48] sm:$0xff] (!%p196_p2)   ;;  %v653_v15 = vld [vmem:[%s789_s1 + $0x50] sm:$0xff] (!%p196_p2)   ;;  %v654_v16 = vld [vmem:[%s789_s1 + $0x58] sm:$0xff] (!%p196_p2)   ;;  %622 = vmatprep.mubr.msk.bf16.mxu1 (!%p196_p2), %vm671_vm3, %v670_v3  ;;  %vm262_vm7 = vsmask.f32 (!%p196_p2), 4352  ;;  %s673_s15 = smov (!%p196_p2), 80  }
   0xa   : > { %v656_v17 = vld [vmem:[%s789_s1 + $0x60] sm:$0xff] (!%p196_p2)   ;;  %v658_v18 = vld [vmem:[%s789_s1 + $0x68] sm:$0xff] (!%p196_p2)   ;;  %v659_v19 = vld [vmem:[%s789_s1 + $0x70] sm:$0xff] (!%p196_p2)   ;;  %vm278_vm10 = vcmask (!%p196_p2), 654336   ;;  %vm472_vm11 = vcmask (!%p196_p2), 916480   ;;  %vm517_vm12 = vcmask (!%p196_p2), 523264  }
   0xb   : > { %478 = vmatpush1.bf16.msra.mxu0 (!%p196_p2), %v644_v4  ;;  %621 = vmatpush3.bf16.msra.mxu1 (!%p196_p2), %v657_v7  ;;  %vm259_vm8 = vmand (!%p196_p2), %vm257_vm4, %vm258_vm5  ;;  %v596_v43 = vld [vmem:[%s792_s4] ss:$0 sm:$0xff] (!%p196_p2) }
   0xc   : > { %479 = vmatprep.subr.bf16.mxu0 (!%p196_p2), %v669_v2  ;;  %vm263_vm9 = vmand (!%p196_p2), %vm261_vm6, %vm262_vm7 }
   0xd   : > { %s795_s19 = smov (!%p225_p3, %s584_s19), 1 }
   0xe   : > { %s589_s20 = sshll.u32 %s795_s19, 2  ;;  %s591_s21 = sshll.u32 %s795_s19, 3 }
   0xf   : > { %s228_s23 = scalar_lea.vmem %s788_s0, %s589_s20  ;;  %480 = vmatpush1.bf16.msra.mxu0 %v645_v6  ;;  %s232_s12 = scalar_lea.vmem %s790_s2, %s589_s20 }
  0x10   : > { %v642_v0 = vld [vmem:[%s228_s23] ss:$0 sps:$4 sm:$0xff]   ;;  %481 = vmatprep.subr.bf16.mxu0 %v669_v2  ;;  %s672_s20 = smov 32  }
  0x11   : > { %242 = vrot.lane.b32.xlu0 %v642_v0, %s668_s24  ;;  %v315_v21 = vld [vmem:[%s232_s12] sm:$0xf]  ;;  %s236_s24 = scalar_lea.vmem %s793_s5, %s591_s21 }
  0x12   : > { %623 = vmatmul.mubr.msk.bf16.vlgmr.msra.gmra.mrb[0].mxu1 %vm282_vm2, %v315_v21 }
  0x13   : > { %482 = vmatpush1.bf16.msra.mxu0 %v646_v8 }
  0x14   : > { %483 = vmatprep.subr.bf16.mxu0 %v669_v2 }
  0x17   : > { %484 = vmatpush1.bf16.msra.mxu0 %v647_v9 }
  0x18   : > { %485 = vmatprep.subr.bf16.mxu0 %v669_v2 }
  0x1b   : > { %486 = vmatpush1.bf16.msra.mxu0 %v648_v10 }
  0x1c   : > { %487 = vmatprep.subr.bf16.mxu0 %v669_v2 }
  0x1f   : > { %488 = vmatpush1.bf16.msra.mxu0 %v649_v11 }
  0x20   : > { %489 = vmatprep.subr.bf16.mxu0 %v669_v2 }
  0x23   : > { %490 = vmatpush1.bf16.msra.mxu0 %v650_v12 }
  0x24   : > { %491 = vmatprep.subr.bf16.mxu0 %v669_v2 }
  0x27   : > { %492 = vmatpush1.bf16.msra.mxu0 %v651_v13 }
  0x28   : > { %493 = vmatprep.subr.bf16.mxu0 %v669_v2 }
  0x2b   : > { %494 = vmatpush1.bf16.msra.mxu0 %v652_v14 }
  0x2c   : > { %495 = vmatprep.subr.bf16.mxu0 %v669_v2 }
  0x2f   : > { %496 = vmatpush1.bf16.msra.mxu0 %v653_v15 }
  0x30   : > { %497 = vmatprep.subr.bf16.mxu0 %v669_v2 }
  0x33   : > { %498 = vmatpush1.bf16.msra.mxu0 %v654_v16 }
  0x34   : > { %499 = vmatprep.subr.bf16.mxu0 %v669_v2 }
  0x37   : > { %500 = vmatpush1.bf16.msra.mxu0 %v656_v17 }
  0x38   : > { %501 = vmatprep.subr.bf16.mxu0 %v669_v2 }
  0x3b   : > { %502 = vmatpush1.bf16.msra.mxu0 %v658_v18 }
  0x3c   : > { %503 = vmatprep.subr.bf16.mxu0 %v669_v2 }
  0x3f   : > { %504 = vmatpush1.bf16.msra.mxu0 %v659_v19 }
  0x83   : > { %v243_v20 = vpop.permute.xlu0 %242 }
  0x84   : > { %v247_v22 = vsel %vm244_vm0, 0, %v243_v20 }
  0x85   : > { %v249_v23 = vsel %vm248_vm1, %v247_v22, 0 }
  0x86   : > { %v250_v24 = vshrl.u32 %v249_v23, 16  ;;  %v253_v26 = vshll.u32 %v249_v23, 16 }
  0x88   : > { %v252_v25 = vrot.slane %v250_v24, 7 }
  0x8a   : > { %v255_v27 = vor.u32 %v253_v26, %v252_v25 }
  0x8c   : > { %v260_v28 = vsel %vm259_vm8, 0, %v255_v27 }
  0x8d   : > { %v264_v29 = vsel %vm263_vm9, %v260_v28, 0 }
  0x8e   : > { %v275_v30 = vrot.slane %v264_v29, 1  ;;  %v268_v31 = vshll.u32 %v264_v29, 16  ;;  %v266_v32 = vshrl.u32 %v264_v29, 16 }
  0x90   : > { %276 = vrot.lane.b32.xlu1 %v275_v30, %s672_s20  ;;  %v270_v33 = vrot.slane %v268_v31, 1 }
  0x92   : > { %v271_v34 = vor.u32 %v270_v33, %v266_v32 }
  0x94   : > { %272 = vrot.lane.b32.xlu0 %v271_v34, %s673_s15 }
  0xe5   : > { %v369_v39 = vpop.f32.mrb[0].mxu1 }
  0xe6   : > { %v624_v40 = vpop.f32.mrb[1].mxu1  ;;  %v626_v44 = vadd.f32 %v596_v43, %v369_v39 }
  0xe7   : > { %v372_v41 = vpop.f32.mrb[2].mxu1 }
  0xe8   : > { %v625_v42 = vpop.f32.mrb[3].mxu1 }
 0x102   : > { %v277_v35 = vpop.permute.xlu1 %276 }
 0x106   : > { %v273_v36 = vpop.permute.xlu0 %272 }
 0x107   : > { %v284_v37 = vsel %vm282_vm2, %v273_v36, %v277_v35  ;;  %v280_v38 = vsel %vm278_vm10, %v264_v29, %v273_v36 }
 0x108   : > { %612 = vmatprep.mubr.msk.bf16.mxu0 %vm472_vm11, %v284_v37 }
 0x109   : > { %508 = vmatmul.mubr.bf16.vlgmr.msra.gmra.mrb[0].mxu0 %v280_v38 }
 0x1dc   : > { %v509_v45 = vpop.f32.mrb[0].mxu0 }
 0x1dd   : > { %v627_v46 = vadd.f32 %v626_v44, %v509_v45  ;;  %v511_v47 = vpop.f32.mrb[1].mxu0 }
 0x1de   : > { %v512_v48 = vpop.f32.mrb[2].mxu0 }
 0x1df   : > { %v516_v49 = vmax.f32 %v627_v46, 0.0  ;;  %v513_v50 = vpop.f32.mrb[3].mxu0 }
 0x1e1   : > { %518 = vst.msk [vmem:[%s236_s24] sm:$0xff] %vm517_vm12, %v516_v49 }
 0x1e2 PF: > { %s15_s18 = sadd.s32 1, %s666_s18  }
 0x1e3   : > { %p12_p4 = scmp.ge.s32.totalorder %s15_s18, 4  }
 0x1e5   :  { %14 = sbr.rel (!%p12_p4) target bundleno = 1 (0x1), region = 73 }

</bundles_post_ra>
